<compile_context>
chip_gen: v7x
topology: tpu7x:2x2x1
jax: 0.10.0
libtpu: 0.0.40
codegen_flags: <defaults>
</compile_context>

<pallas_src>
import jax
import jax.numpy as jnp
from jax import lax
from jax.experimental import pallas as pl
from jax.experimental.pallas import tpu as pltpu

_LANE = 128
_SUBLANE = 8


def _vmem_capacity_bytes():
    try:
        return int(pltpu.get_tpu_info().vmem_capacity_bytes)
    except Exception:
        return 64 * 2**20          # conservative: assume v7x-sized VMEM


def _budgets(itemsize):
    """(tile_target_edge, per_tile_byte_budget, scoped_vmem_cap) per generation."""
    cap = _vmem_capacity_bytes()
    if cap >= 96 * 2**20:          # v5e / v6e: 128 MiB VMEM per TensorCore
        tile_budget = 8 * 2**20
        vmem_cap = 96 * 2**20
    else:                          # v7x: 64 MiB per TensorCore -> leave headroom
        tile_budget = 4 * 2**20
        vmem_cap = 48 * 2**20
    # dtype-aware: keep contiguous DMA rows >= 2 KiB even for narrow dtypes.
    tile_target = max(1024, 2048 // max(int(itemsize), 1))
    return tile_target, tile_budget, vmem_cap


def _round_down(v, align):
    return max((int(v) // align) * align, align)


def _sublane_align(dtype):
    itemsize = jnp.dtype(dtype).itemsize
    return max(_SUBLANE, _SUBLANE * (4 // max(itemsize, 1)))   # f32:8 bf16:16 i8:32


def _pick_tile_lane_dense(dim, target):
    """Tile edge for an axis that is a lane axis on at least one side of the
    transpose: full extent when <= 128, otherwise the largest 128-multiple
    <= min(target, dim) so interior tiles stay lane dense on both sides."""
    if dim <= _LANE:
        return dim
    return _round_down(min(target, dim), _LANE)


# ------------------------------ kernel bodies ------------------------------

def _copy_kernel(x_ref, o_ref):
    # Pure DMA relayout: the transpose lives entirely in the index maps.
    o_ref[...] = x_ref[...]


def _tile_transpose_kernel(x_ref, o_ref):
    # (tr, tc) -> (tc, tr)
    o_ref[...] = jnp.swapaxes(x_ref[...], -2, -1)


def _batched_tile_transpose_kernel(x_ref, o_ref):
    # (L, tr, tc) -> (L, tc, tr); done slice-by-slice with rank-2 transposes,
    # which Mosaic lowers reliably on every generation.
    l_extent = x_ref.shape[0]
    if l_extent <= 8:
        for l in range(l_extent):
            o_ref[l] = jnp.swapaxes(x_ref[l], 0, 1)
    else:
        def body(l, carry):
            o_ref[l] = jnp.swapaxes(x_ref[l], 0, 1)
            return carry
        lax.fori_loop(0, l_extent, body, 0, unroll=4)


# --------------------------------- wrapper ---------------------------------

def pallas_transpose(x, dim0, dim1, *, min_pallas_bytes=0):
    """Equivalent of torch.Tensor.transpose(dim0, dim1)."""
    n = x.ndim
    if n == 0:
        return x
    d0, d1 = dim0 % n, dim1 % n
    if d0 == d1:
        return x
    d0, d1 = min(d0, d1), max(d0, d1)

    itemsize = jnp.dtype(x.dtype).itemsize
    if x.size == 0 or x.size * itemsize < min_pallas_bytes:
        # Tiny tensors: pallas_call launch overhead dwarfs the data movement.
        return jnp.swapaxes(x, d0, d1)

    out_shape = list(x.shape)
    out_shape[d0], out_shape[d1] = x.shape[d1], x.shape[d0]
    out_shape = tuple(out_shape)

    if d0 < n - 2 <= d1:
        # TODO(synk): mixed swap (a leading dim <-> one of the last two dims)
        # needs a rank-3 lane/sublane shuffle Mosaic does not lower reliably;
        # let XLA handle that layout change.
        return jnp.swapaxes(x, d0, d1)

    tile_target, tile_budget, vmem_cap = _budgets(itemsize)
    R, C = x.shape[-2], x.shape[-1]
    n_lead = n - 2

    if d1 <= n - 3:
        # ------------- Case A: both swapped dims are leading dims -------------
        trailing = tuple(x.shape[d1 + 1:])
        slab_bytes = int(itemsize)
        for s in trailing:
            slab_bytes *= int(s)

        if slab_bytes <= tile_budget:
            # Fold the whole contiguous trailing slab into one block; the grid
            # only iterates dims 0..d1 -> one large contiguous DMA per step.
            n_trail = n - (d1 + 1)
            grid = tuple(out_shape[:d1 + 1])
            blk = tuple([pl.Squeezed()] * (d1 + 1)) + trailing

            def in_map(*g):
                g = list(g)
                g[d0], g[d1] = g[d1], g[d0]          # the transpose happens here
                return tuple(g) + (0,) * n_trail

            def out_map(*g):
                return tuple(g) + (0,) * n_trail

            kernel = _copy_kernel
            in_spec = pl.BlockSpec(blk, in_map)
            out_spec = pl.BlockSpec(blk, out_map)
            block_bytes = slab_bytes
        else:
            # Trailing slab exceeds the VMEM budget: grid over the leading dims
            # and tile the last two dims (still a pure-copy body).
            r_align = _sublane_align(x.dtype)
            tr = R if R <= tile_target else _round_down(tile_target, r_align)
            tc = C if C <= tile_target else _round_down(tile_target, _LANE)
            while tr * tc * itemsize > tile_budget and (tr > r_align or tc > _LANE):
                if tr >= tc and tr > r_align:
                    tr = _round_down(tr // 2, r_align)
                else:
                    tc = _round_down(tc // 2, _LANE)

            grid = tuple(out_shape[:n_lead]) + (pl.cdiv(R, tr), pl.cdiv(C, tc))
            blk = tuple([pl.Squeezed()] * n_lead) + (tr, tc)

            def in_map(*g):
                g = list(g)
                g[d0], g[d1] = g[d1], g[d0]
                return tuple(g)

            def out_map(*g):
                return tuple(g)

            kernel = _copy_kernel
            in_spec = pl.BlockSpec(blk, in_map)
            out_spec = pl.BlockSpec(blk, out_map)
            block_bytes = tr * tc * itemsize
    else:
        # ------------- Case B: swap of the last two (minor) dims -------------
        # 128-aligned edges so interior OUTPUT tiles are lane dense too.
        tr = _pick_tile_lane_dense(R, tile_target)
        tc = _pick_tile_lane_dense(C, tile_target)
        while tr * tc * itemsize > tile_budget and (tr > _LANE or tc > _LANE):
            if tr >= tc and tr > _LANE:
                tr = _round_down(tr // 2, _LANE)
            else:
                tc = _round_down(tc // 2, _LANE)

        lead = tuple(x.shape[:n_lead])
        lead_prod = 1
        for s in lead:
            lead_prod *= int(s)

        # v7x megacore: if everything would land in a single block, split the
        # larger transposed dim so both TensorCores get independent work.
        if lead_prod * pl.cdiv(R, tr) * pl.cdiv(C, tc) == 1:
            if R >= 2 * _LANE:
                tr = _round_down(-(-R // 2), _LANE)
            elif C >= 2 * _LANE:
                tc = _round_down(-(-C // 2), _LANE)

        tile_bytes = tr * tc * itemsize
        batch_l = 1
        if n_lead >= 1 and tr == R and tc == C:
            # Small (R, C): batch the innermost leading dim into the block to
            # amortize the ~0.35us/step cost and enlarge every DMA.
            batch_l = min(int(lead[-1]), max(1, tile_budget // max(tile_bytes, 1)))
            if batch_l > 1:
                rem_prod = lead_prod // int(lead[-1])
                if rem_prod * pl.cdiv(int(lead[-1]), batch_l) < 2 and int(lead[-1]) > 1:
                    batch_l = -(-int(lead[-1]) // 2)   # keep >= 2 blocks (megacore)

        def in_map(*g):
            return tuple(g)

        def out_map(*g):
            return tuple(g[:-2]) + (g[-1], g[-2])

        if batch_l > 1:
            grid = tuple(lead[:-1]) + (
                pl.cdiv(int(lead[-1]), batch_l), pl.cdiv(R, tr), pl.cdiv(C, tc))
            in_blk = tuple([pl.Squeezed()] * (n_lead - 1)) + (batch_l, tr, tc)
            out_blk = tuple([pl.Squeezed()] * (n_lead - 1)) + (batch_l, tc, tr)
            kernel = _batched_tile_transpose_kernel
            block_bytes = batch_l * tile_bytes
        else:
            grid = lead + (pl.cdiv(R, tr), pl.cdiv(C, tc))
            in_blk = tuple([pl.Squeezed()] * n_lead) + (tr, tc)
            out_blk = tuple([pl.Squeezed()] * n_lead) + (tc, tr)
            kernel = _tile_transpose_kernel
            block_bytes = tile_bytes

        in_spec = pl.BlockSpec(in_blk, in_map)
        out_spec = pl.BlockSpec(out_blk, out_map)

    # 2 pipeline buffers each for input and output blocks, plus headroom; the
    # cap keeps us well inside v7x's 64 MiB per-core VMEM.
    vmem_limit = int(min(vmem_cap, max(32 * 2**20, 4 * block_bytes + 2 * 2**20)))

    return pl.pallas_call(
        kernel,
        out_shape=jax.ShapeDtypeStruct(out_shape, x.dtype),
        grid=grid,
        in_specs=[in_spec],
        out_specs=out_spec,
        compiler_params=pltpu.CompilerParams(
            dimension_semantics=("parallel",) * len(grid),
            vmem_limit_bytes=vmem_limit,
        ),
    )(x)


if __name__ == "__main__":
    key = jax.random.PRNGKey(0)
    k1, k2, k3, k4, k5, k6 = jax.random.split(key, 6)

    # Transpose(2, 3) on an NCHW-style input -> batched last-two-dims transpose
    # (innermost leading dim folded into the block: (4,16,16) per grid step).
    x = jax.random.normal(k1, (2, 4, 16, 16), dtype=jnp.float32)
    y = pallas_transpose(x, 2, 3)
    jax.block_until_ready(y)
    assert y.shape == (2, 4, 16, 16)
    assert jnp.array_equal(y, jnp.swapaxes(x, 2, 3))

    # Transpose(0, 1) on a 4-D input -> copy-only kernel, swap via index maps.
    x2 = jax.random.normal(k2, (2, 4, 16, 32), dtype=jnp.float32)
    y2 = pallas_transpose(x2, 0, 1)
    jax.block_until_ready(y2)
    assert y2.shape == (4, 2, 16, 32)
    assert jnp.array_equal(y2, jnp.swapaxes(x2, 0, 1))

    # Transpose(0, 1) on a 2-D tensor -> single-tile lane/sublane transpose.
    x3 = jax.random.normal(k3, (8, 128), dtype=jnp.float32)
    y3 = pallas_transpose(x3, 0, 1)
    jax.block_until_ready(y3)
    assert y3.shape == (128, 8)
    assert jnp.array_equal(y3, x3.T)

    # Mixed swap (leading <-> minor dim): handled by the XLA fallback path.
    x4 = jax.random.normal(k4, (2, 4, 8, 32), dtype=jnp.float32)
    y4 = pallas_transpose(x4, 1, 3)
    jax.block_until_ready(y4)
    assert y4.shape == (2, 32, 8, 4)
    assert jnp.array_equal(y4, jnp.swapaxes(x4, 1, 3))

    # Transpose(0, 1) on a 5-D input -> the whole contiguous trailing slab
    # (4, 8, 128) is folded into one block; grid only over the swapped dims.
    x5 = jax.random.normal(k5, (2, 3, 4, 8, 128), dtype=jnp.float32)
    y5 = pallas_transpose(x5, 0, 1)
    jax.block_until_ready(y5)
    assert y5.shape == (3, 2, 4, 8, 128)
    assert jnp.array_equal(y5, jnp.swapaxes(x5, 0, 1))

    # Transpose(-2, -1) with non-tile-aligned edges and a batched leading dim.
    x6 = jax.random.normal(k6, (4, 3, 40, 24), dtype=jnp.float32)
    y6 = pallas_transpose(x6, -2, -1)
    jax.block_until_ready(y6)
    assert y6.shape == (4, 3, 24, 40)
    assert jnp.array_equal(y6, jnp.swapaxes(x6, -2, -1))

    print("KERNEL_OK")
</pallas_src>

<mosaic_0001>
module attributes {stable_mosaic.version = 11 : i64} {
  func.func @_batched_tile_transpose_kernel(%arg0: i32, %arg1: i32, %arg2: i32, %arg3: i32, %arg4: memref<1x4x16x16xf32, #tpu.memory_space<vmem>>, %arg5: memref<1x4x16x16xf32, #tpu.memory_space<vmem>>) attributes {dimension_semantics = [#tpu.dimension_semantics<parallel>, #tpu.dimension_semantics<parallel>, #tpu.dimension_semantics<parallel>, #tpu.dimension_semantics<parallel>], iteration_bounds = array<i64: 2, 1, 1, 1>, scalar_prefetch = 0 : i64, scratch_operands = 0 : i64, tpu.core_type = #tpu.core_type<tc>, window_params = [{transform_indices = @transform_0, window_bounds = array<i64: 1, 4, 16, 16>}, {transform_indices = @transform_1, window_bounds = array<i64: 1, 4, 16, 16>}]} {
    %c0 = arith.constant 0 : index
    %c0_0 = arith.constant 0 : index
    %c0_1 = arith.constant 0 : index
    %c0_2 = arith.constant 0 : index
    %0 = vector.load %arg4[%c0, %c0_0, %c0_1, %c0_2] : memref<1x4x16x16xf32, #tpu.memory_space<vmem>>, vector<1x1x16x16xf32>
    %1 = vector.shape_cast %0 : vector<1x1x16x16xf32> to vector<16x16xf32>
    %2 = tpu.transpose %1, [1, 0] : vector<16x16xf32> -> vector<16x16xf32>
    %c0_3 = arith.constant 0 : index
    %c0_4 = arith.constant 0 : index
    %c0_5 = arith.constant 0 : index
    %c0_6 = arith.constant 0 : index
    %3 = vector.load %arg5[%c0_3, %c0_4, %c0_5, %c0_6] : memref<1x4x16x16xf32, #tpu.memory_space<vmem>>, vector<1x1x16x16xf32>
    %4 = vector.shape_cast %3 : vector<1x1x16x16xf32> to vector<16x16xf32>
    %5 = vector.shape_cast %2 : vector<16x16xf32> to vector<1x1x16x16xf32>
    tpu.vector_store %arg5[%c0_3, %c0_4, %c0_5, %c0_6], %5 {strides = array<i32>} : memref<1x4x16x16xf32, #tpu.memory_space<vmem>>, vector<1x1x16x16xf32>,
    %c0_7 = arith.constant 0 : index
    %c1 = arith.constant 1 : index
    %c0_8 = arith.constant 0 : index
    %c0_9 = arith.constant 0 : index
    %6 = vector.load %arg4[%c0_7, %c1, %c0_8, %c0_9] : memref<1x4x16x16xf32, #tpu.memory_space<vmem>>, vector<1x1x16x16xf32>
    %7 = vector.shape_cast %6 : vector<1x1x16x16xf32> to vector<16x16xf32>
    %8 = tpu.transpose %7, [1, 0] : vector<16x16xf32> -> vector<16x16xf32>
    %c0_10 = arith.constant 0 : index
    %c1_11 = arith.constant 1 : index
    %c0_12 = arith.constant 0 : index
    %c0_13 = arith.constant 0 : index
    %9 = vector.load %arg5[%c0_10, %c1_11, %c0_12, %c0_13] : memref<1x4x16x16xf32, #tpu.memory_space<vmem>>, vector<1x1x16x16xf32>
    %10 = vector.shape_cast %9 : vector<1x1x16x16xf32> to vector<16x16xf32>
    %11 = vector.shape_cast %8 : vector<16x16xf32> to vector<1x1x16x16xf32>
    tpu.vector_store %arg5[%c0_10, %c1_11, %c0_12, %c0_13], %11 {strides = array<i32>} : memref<1x4x16x16xf32, #tpu.memory_space<vmem>>, vector<1x1x16x16xf32>,
    %c0_14 = arith.constant 0 : index
    %c2 = arith.constant 2 : index
    %c0_15 = arith.constant 0 : index
    %c0_16 = arith.constant 0 : index
    %12 = vector.load %arg4[%c0_14, %c2, %c0_15, %c0_16] : memref<1x4x16x16xf32, #tpu.memory_space<vmem>>, vector<1x1x16x16xf32>
    %13 = vector.shape_cast %12 : vector<1x1x16x16xf32> to vector<16x16xf32>
    %14 = tpu.transpose %13, [1, 0] : vector<16x16xf32> -> vector<16x16xf32>
    %c0_17 = arith.constant 0 : index
    %c2_18 = arith.constant 2 : index
    %c0_19 = arith.constant 0 : index
    %c0_20 = arith.constant 0 : index
    %15 = vector.load %arg5[%c0_17, %c2_18, %c0_19, %c0_20] : memref<1x4x16x16xf32, #tpu.memory_space<vmem>>, vector<1x1x16x16xf32>
    %16 = vector.shape_cast %15 : vector<1x1x16x16xf32> to vector<16x16xf32>
    %17 = vector.shape_cast %14 : vector<16x16xf32> to vector<1x1x16x16xf32>
    tpu.vector_store %arg5[%c0_17, %c2_18, %c0_19, %c0_20], %17 {strides = array<i32>} : memref<1x4x16x16xf32, #tpu.memory_space<vmem>>, vector<1x1x16x16xf32>,
    %c0_21 = arith.constant 0 : index
    %c3 = arith.constant 3 : index
    %c0_22 = arith.constant 0 : index
    %c0_23 = arith.constant 0 : index
    %18 = vector.load %arg4[%c0_21, %c3, %c0_22, %c0_23] : memref<1x4x16x16xf32, #tpu.memory_space<vmem>>, vector<1x1x16x16xf32>
    %19 = vector.shape_cast %18 : vector<1x1x16x16xf32> to vector<16x16xf32>
    %20 = tpu.transpose %19, [1, 0] : vector<16x16xf32> -> vector<16x16xf32>
    %c0_24 = arith.constant 0 : index
    %c3_25 = arith.constant 3 : index
    %c0_26 = arith.constant 0 : index
    %c0_27 = arith.constant 0 : index
    %21 = vector.load %arg5[%c0_24, %c3_25, %c0_26, %c0_27] : memref<1x4x16x16xf32, #tpu.memory_space<vmem>>, vector<1x1x16x16xf32>
    %22 = vector.shape_cast %21 : vector<1x1x16x16xf32> to vector<16x16xf32>
    %23 = vector.shape_cast %20 : vector<16x16xf32> to vector<1x1x16x16xf32>
    tpu.vector_store %arg5[%c0_24, %c3_25, %c0_26, %c0_27], %23 {strides = array<i32>} : memref<1x4x16x16xf32, #tpu.memory_space<vmem>>, vector<1x1x16x16xf32>,
    return
  }
  func.func @transform_0(%arg0: i32, %arg1: i32, %arg2: i32, %arg3: i32) -> (i32, i32, i32, i32) {
    %c0_i32 = arith.constant 0 : i32
    return %arg0, %arg1, %arg2, %arg3 : i32, i32, i32, i32
  }
  func.func @transform_1(%arg0: i32, %arg1: i32, %arg2: i32, %arg3: i32) -> (i32, i32, i32, i32) {
    %c0_i32 = arith.constant 0 : i32
    return %arg0, %arg1, %arg3, %arg2 : i32, i32, i32, i32
  }
}

</mosaic_0001>

<bundles_post_ra>
// kernel: tpu_custom_call.1
= control target key start
LH: loop header
LB: loop body
LE: loop exit
PB: predicated region body
PF: predicated region fallthrough
CT: control target
= control target key end

     0   :  { %6 = vsyncpa [#allocation3], 0  ;;  %s862_s0 = inlined_call_operand.hbm [shape: f32[2,4,16,16], index: 0, kind: input, shape index: {}]   ;;  %s863_s1 = inlined_call_operand.hbm [shape: f32[2,4,16,16], index: 1, kind: output, shape index: {}]  }
   0x1   :  { %8 = vsyncpa [#allocation3 + $0x1], 0 }
   0x2   :  { %9 = vsyncpa [#allocation4], 0 }
   0x3   :  { %11 = vsyncpa [#allocation4 + $0x1], 0  ;;  %s679_s6 = smov 0   ;;  %s681_s7 = smov 0  }
   0x4   :  { %s683_s8 = smov 0   ;;  %s685_s9 = smov 0  }
   0x5   :  { %s687_s10 = smov 0   ;;  %s689_s11 = smov 0  }
   0x6 LB: > { %s453_s12 = sadd.s32 4294967295, %s661_s11   ;;  %s454_s13 = sadd.s32 4294967294, %s661_s11   ;;  %s661_s11 = sphi %s689_s11, %s17_s11   ;;  %s657_s10 = sphi %s687_s10, %s878_s10   ;;  %s653_s9 = sphi %s685_s9, %s877_s9   ;;  %s649_s8 = sphi %s683_s8, %s876_s8   ;;  %s645_s7 = sphi %s681_s7, %s875_s7   ;;  %s641_s6 = sphi %s679_s6, %s874_s6  }
   0x7   : > { %s43_s14 = sadd.s32 1, %s657_s10  ;;  %s56_s15 = sadd.s32 1, %s649_s8 }
   0x8   : > { %p45_p0 = scmp.ge.s32.totalorder %s43_s14, 2  ;;  %p63_p1 = scmp.ne.s32.totalorder %s649_s8, %s645_s7 }
   0x9   : > { %p64_p2 = scmp.eq.s32.totalorder %s661_s11, 0  ;;  %p69_p3 = scmp.ne.s32.totalorder %s645_s7, %s641_s6 }
   0xa   : > { %s880_s14 = smov (%p45_p0, %s43_s14), 0  ;;  %p70_p5 = scmp.eq.s32.totalorder %s453_s12, 0 }
   0xb   : > { %p720_p4 = por %p64_p2, %p63_p1  ;;  %s47_s17 = ssub.s32 %s657_s10, %s880_s14 }
   0xc   : > { %p99_p6 = scmp.eq.s32.totalorder %s453_s12, 1  ;;  %p54_p7 = scmp.eq.s32.totalorder %s47_s17, 0 }
   0xd   : > { %p726_p8 = por %p70_p5, %p69_p3  ;;  %p105_p10 = scmp.eq.s32.totalorder %s454_s13, 1 }
   0xe   : > { %p730_p9 = por %p99_p6, %p63_p1  ;;  %p494_p13 = scmp.lt.s32.totalorder %s661_s11, 2 }
   0xf   : > { %s735_s20 = scalar_select %p54_p7, %s649_s8, %s56_s15  }
  0x10   : > { %s867_s19 = scalar_select %p730_p9, 1, 0 }
  0x11   : > { %p737_p11 = por %p105_p10, %p69_p3  ;;  %s125_s22 = sand.u32 1, %s649_s8  }
  0x12   : > { %s457_s23 = sshll.u32 %s125_s22, 6  ;;  %s480_s24 = sshll.u32 %s657_s10, 10 }
  0x13   : > { %s868_s21 = scalar_select %p737_p11, 1, 0 }
  0x14   : > { %s748_s27 = scalar_lea.hbm %s862_s0, %s480_s24  ;;  %s129_s28 = scalar_lea.vmem [#allocation2], %s457_s23 }
  0x15   : > { %s142_s29 = sshll.u32 %s129_s28, 4  ;;  %p754_p0 = pnand %p494_p13, %p720_p4  ;;  %s750_s29 = int_to_ptr.vmem [resolvable:$true] %s142_s29 }
  0x16   : > { %s759_s2 = scalar_lea.sflag [#allocation3], %s125_s22  ;;  %s549_s3 = scalar_lea.hbm %s748_s27, 1024 }
  0x17   : > { %p550_p2 = scmp.ne.s32.totalorder %s748_s27, %s549_s3  ;;  %p551_p3 = pneg %p754_p0 }
  0x18   : > { %s554_s12 = scalar_lea.hbm %s862_s0, 2048  ;;  %p555_p4 = scmp.lt.u32.totalorder %s748_s27, %s862_s0 }
  0x19   : > { %p552_p5 = pnand %p551_p3, %p550_p2  ;;  %p556_p7 = scmp.lt.u32.totalorder %s554_s12, %s549_s3 }
  0x1a   : > { %p558_p13 = scmp.lt.u32.totalorder %s549_s3, %s748_s27 }
  0x1b   : > { %p553_p6 = pneg %p552_p5  ;;  %p557_p10 = por %p556_p7, %p555_p4 }
  0x1d   : > { %p559_p12 = por %p558_p13, %p557_p10 }
  0x1f   : > { %p560_p1 = pnand %p559_p12, %p553_p6 }
  0x21   : > { %563 = shalt.err (!%p560_p1)
}
  0x22   : > { %s564_s16 = scalar_lea.vmem %s750_s29, 1024  ;;  %s663_s17 = smov [#allocation2]  }
  0x23   : > { %p565_p2 = scmp.ne.s32.totalorder %s750_s29, %s564_s16  ;;  %s569_s22 = sshll.u32 %s663_s17, 4  ;;  %s570_s22 = int_to_ptr.vmem [resolvable:$false] %s569_s22 }
  0x24   : > { %s571_s23 = scalar_lea.vmem %s570_s22, 2048  ;;  %p572_p9 = scmp.lt.s32.totalorder %s750_s29, %s570_s22 }
  0x25   : > { %p567_p5 = pnand %p565_p2, %p551_p3  ;;  %p573_p4 = scmp.lt.s32.totalorder %s571_s23, %s564_s16 }
  0x27   : > { %p568_p11 = pneg %p567_p5  ;;  %p574_p7 = por %p573_p4, %p572_p9 }
  0x29   : > { %p575_p10 = pnand %p574_p7, %p568_p11 }
  0x2b   : > { %578 = shalt.err (!%p575_p10)
}
  0x2c   : > { %s664_s24 = smov 128   ;;  %s665_s25 = smov 8  }
  0x2d   : > { %489 = dma.hbm_to_vmem [thread:$0]  (!%p754_p0), %s748_s27, 1024, %s750_s29, %s759_s2, %s664_s24, %s664_s24, %s665_s25  }
  0x2e   : > { %p150_p12 = scmp.lt.s32.totalorder %s661_s11, 3  ;;  %p870_p1 = scmp.ge.s32.totalorder %s661_s11, 1 }
  0x30   : > { %p151_p3 = pnand %p870_p1, %p150_p12 }
  0x31   : > { %s791_s26 = sand.u32 (!%p151_p3), 1, %s645_s7  }
  0x32   : > { %154 = sbr.rel (%p151_p3) target bundleno = 215 (0xd7), region = 24  ;;  %s461_s28 = sshll.u32 (!%p151_p3), %s791_s26, 6 }
  0x33   : > { %s157_s3 = scalar_lea.sflag (!%p151_p3), [#allocation3], %s791_s26  ;;  %s160_s4 = scalar_lea.vmem (!%p151_p3), [#allocation2], %s461_s28 }
  0x39   : > { %632 = dma.done.wait (%p726_p8), %s157_s3, 1024  }
  0x3a   : > { %634 = vsyncadd (%p726_p8), %s157_s3, 4294966272  ;;  %v463_v0 = vld [vmem:[%s160_s4 + $0x10] sm:$0xff]  ;;  %v183_v1 = vld [vmem:[%s160_s4] sm:$0xff]  ;;  %vm217_vm0 = vcmask 130048   ;;  %s178_s18 = scalar_lea.vmem [#allocation5], %s461_s28  ;;  %s481_s29 = sshll.u32 %s653_s9, 10 }
  0x3b   : > { %223 = vxpose.xlu1.b32.start [1/2] (short) (narrow) %v463_v0, 16  ;;  %185 = vxpose.xlu0.b32.start [1/2] (short) (narrow) %v183_v1, 16  ;;  %v464_v2 = vld [vmem:[%s160_s4 + $0x18] sm:$0xff]  ;;  %v184_v3 = vld [vmem:[%s160_s4 + $0x8] sm:$0xff]  ;;  %v471_v4 = vld [vmem:[%s160_s4 + $0x30] sm:$0xff]  ;;  %s354_s27 = sshll.u32 %s178_s18, 4  ;;  %s811_s5 = scalar_lea.hbm %s863_s1, %s481_s29  ;;  %s804_s27 = int_to_ptr.vmem [resolvable:$true] %s354_s27 }
  0x3c   : > { %v467_v5 = vld [vmem:[%s160_s4 + $0x20] sm:$0xff]  ;;  %v472_v6 = vld [vmem:[%s160_s4 + $0x38] sm:$0xff]  ;;  %v468_v7 = vld [vmem:[%s160_s4 + $0x28] sm:$0xff]  ;;  %s335_s9 = scalar_lea.sflag [#allocation4], %s791_s26  ;;  %s579_s12 = scalar_lea.vmem %s804_s27, 1024 }
  0x3d   : > { %p580_p8 = scmp.ne.s32.totalorder %s804_s27, %s579_s12  ;;  %p871_p9 = scmp.ne.s32.totalorder %s867_s19, 0 }
  0x3e   : > { %s666_s13 = smov [#allocation5]  }
  0x3f   : > { %224 = vxpose.xlu1.b32.end [2/2] (short) (narrow) %v464_v2, 16  ;;  %186 = vxpose.xlu0.b32.end [2/2] (short) (narrow) %v184_v3, 16  ;;  %p581_p11 = pnand %p580_p8, %p871_p9  ;;  %s583_s15 = sshll.u32 %s666_s13, 4  ;;  %s584_s15 = int_to_ptr.vmem [resolvable:$false] %s583_s15 }
  0x40   : > { %s585_s16 = scalar_lea.vmem %s584_s15, 2048  ;;  %p586_p6 = scmp.lt.s32.totalorder %s804_s27, %s584_s15 }
  0x41   : > { %p582_p0 = pneg %p581_p11  ;;  %p587_p13 = scmp.lt.s32.totalorder %s585_s16, %s579_s12 }
  0x43   : > { %299 = vxpose.xlu1.b32.start [1/2] (short) (narrow) %v471_v4, 16  ;;  %261 = vxpose.xlu0.b32.start [1/2] (short) (narrow) %v467_v5, 16  ;;  %p588_p2 = por %p587_p13, %p586_p6 }
  0x45   : > { %p589_p5 = pnand %p588_p2, %p582_p0 }
  0x47   : > { %300 = vxpose.xlu1.b32.end [2/2] (short) (narrow) %v472_v6, 16  ;;  %262 = vxpose.xlu0.b32.end [2/2] (short) (narrow) %v468_v7, 16 }
  0xbb   : > { %v239_v8 = vpop.trf.xlu1  ;;  %v201_v9 = vpop.trf.xlu0 }
  0xbc   : > { %465 = vst.msk [vmem:[%s178_s18 + $0x10] sm:$0xff] %vm217_vm0, %v239_v8  ;;  %218 = vst.msk [vmem:[%s178_s18] sm:$0xff] %vm217_vm0, %v201_v9 }
  0xbf   : > { %v240_v10 = vpop.trf.xlu1  ;;  %v202_v11 = vpop.trf.xlu0 }
  0xc0   : > { %466 = vst.msk [vmem:[%s178_s18 + $0x18] sm:$0xff] %vm217_vm0, %v240_v10  ;;  %219 = vst.msk [vmem:[%s178_s18 + $0x8] sm:$0xff] %vm217_vm0, %v202_v11 }
  0xc3   : > { %v315_v12 = vpop.trf.xlu1  ;;  %v277_v13 = vpop.trf.xlu0 }
  0xc4   : > { %473 = vst.msk [vmem:[%s178_s18 + $0x30] sm:$0xff] %vm217_vm0, %v315_v12  ;;  %469 = vst.msk [vmem:[%s178_s18 + $0x20] sm:$0xff] %vm217_vm0, %v277_v13 }
  0xc7   : > { %v316_v14 = vpop.trf.xlu1  ;;  %v278_v15 = vpop.trf.xlu0 }
  0xc8   : > { %474 = vst.msk [vmem:[%s178_s18 + $0x38] sm:$0xff] %vm217_vm0, %v316_v14  ;;  %470 = vst.msk [vmem:[%s178_s18 + $0x28] sm:$0xff] %vm217_vm0, %v278_v15 }
  0xc9   : > { %592 = shalt.err (!%p589_p5)
}
  0xca   : > { %s593_s17 = scalar_lea.hbm %s811_s5, 1024  ;;  %s597_s24 = scalar_lea.hbm %s863_s1, 2048 }
  0xcb   : > { %p594_p4 = scmp.ne.s32.totalorder %s811_s5, %s593_s17  ;;  %p598_p12 = scmp.lt.u32.totalorder %s811_s5, %s863_s1 }
  0xcc   : > { %p599_p1 = scmp.lt.u32.totalorder %s597_s24, %s593_s17  ;;  %p601_p8 = scmp.lt.u32.totalorder %s593_s17, %s811_s5 }
  0xcd   : > { %p595_p7 = pnand %p594_p4, %p871_p9 }
  0xce   : > { %p600_p3 = por %p599_p1, %p598_p12 }
  0xcf   : > { %p596_p10 = pneg %p595_p7 }
  0xd0   : > { %p602_p11 = por %p601_p8, %p600_p3 }
  0xd2   : > { %p603_p0 = pnand %p602_p11, %p596_p10 }
  0xd4   : > { %606 = shalt.err (!%p603_p0)
}
  0xd5   : > { %s667_s3 = smov 128   ;;  %s668_s4 = smov 8  }
  0xd6   : > { %484 = dma.vmem_to_hbm [thread:$0]  (%p871_p9), %s804_s27, 1024, %s811_s5, %s335_s9, %s667_s3, %s667_s3, %s668_s4  }
  0xd7 PF: > { %s369_s18 = sand.u32 1, %s641_s6   ;;  %p872_p6 = scmp.ne.s32.totalorder %s868_s21, 0 }
  0xd8   : > { %p873_p13 = scmp.ge.s32.totalorder %s661_s11, 2  ;;  %s370_s29 = scalar_lea.sflag [#allocation4], %s369_s18 }
  0xda   : > { %p491_p2 = pnand %p873_p13, %p872_p6 }
  0xdc   : > { %636 = dma.done.wait (!%p491_p2), %s370_s29, 1024  }
  0xdd   : > { %638 = vsyncadd (!%p491_p2), %s370_s29, 4294966272  ;;  %s17_s11 = sadd.s32 1, %s661_s11   ;;  %s874_s6 = smov %s645_s7 }
  0xde   : > { %p14_p5 = scmp.ge.s32.totalorder %s17_s11, 4   ;;  %s875_s7 = smov %s649_s8 }
  0xdf   : > { %s876_s8 = smov %s735_s20  ;;  %s877_s9 = smov %s657_s10 }
  0xe0   : > { %s878_s10 = smov %s880_s14  ;;  %16 = sbr.rel (!%p14_p5) target bundleno = 6 (0x6), region = 75 }
  0xe7   :  { %375 = vsyncpa [#allocation3], 1 }
  0xe8   :  { %377 = vsyncpa [#allocation3 + $0x1], 1 }
  0xe9   :  { %378 = vsyncpa [#allocation4], 1 }
  0xea   :  { %380 = vsyncpa [#allocation4 + $0x1], 1 }

</bundles_post_ra>
